<compile_context>
chip_gen: v7x
topology: tpu7x:2x2x1
jax: 0.10.0
libtpu: 0.0.40
codegen_flags: <defaults>
</compile_context>

<pallas_src>
import functools

import jax
import jax.numpy as jnp
from jax.experimental import pallas as pl
from jax.experimental.pallas import tpu as pltpu


def _round_up(n, m):
    return ((n + m - 1) // m) * m


# ---------------------------------------------------------------------------
# Kernel
# ---------------------------------------------------------------------------
def _mlp_kernel(xt_ref, w_ref, b_ref, o_ref):
    """xt_ref: (F, bb) bf16 (batch on lanes); w_ref: (128, Wcols) bf16 packed slab;
    b_ref: (128, 1) f32 packed biases; o_ref: (1, bb) f32 lane-dense output row."""
    f = xt_ref.shape[0]
    xt = xt_ref[...]                                   # (F, bb) bf16

    # Packed parameter slices (static, sublane/lane-pack aligned offsets).
    w1 = w_ref[0:64, 0:f]                              # (64, F)   bf16
    w2 = w_ref[64:96, 0:64]                            # (32, 64)  bf16
    w3 = w_ref[96:112, 0:32]                           # (16, 32)  bf16
    w4 = w_ref[112:128, 0:1].astype(jnp.float32)       # (16, 1)   f32 (fc4 as a column)
    b1 = b_ref[0:64, :]                                # (64, 1)   f32
    b2 = b_ref[64:96, :]                               # (32, 1)
    b3 = b_ref[96:112, :]                              # (16, 1)
    b4 = b_ref[112:113, :]                             # (1, 1)

    # fc1 + ReLU: (64, F) @ (F, bb) -> (64, bb), f32 accumulation.
    h = jnp.dot(w1, xt, preferred_element_type=jnp.float32)
    h = jnp.maximum(h + b1, 0.0)

    # fc2 + ReLU -> (32, bb)
    h = jnp.dot(w2, h.astype(jnp.bfloat16), preferred_element_type=jnp.float32)
    h = jnp.maximum(h + b2, 0.0)

    # fc3 + ReLU -> (16, bb)
    h = jnp.dot(w3, h.astype(jnp.bfloat16), preferred_element_type=jnp.float32)
    h = jnp.maximum(h + b3, 0.0)

    # fc4 (K=16, N=1): VPU multiply + sublane reduce (XLU) instead of an N=1 MXU pass.
    z = jnp.sum(h * w4, axis=0, keepdims=True) + b4    # (1, bb) f32

    # Sigmoid on the EUP (free slot in this mem-bound kernel).
    o_ref[...] = jax.nn.sigmoid(z)


# ---------------------------------------------------------------------------
# Parameter packing (PyTorch (out, in) layout -> one bf16 slab + one f32 bias slab)
# ---------------------------------------------------------------------------
def pack_params(params):
    f = params["w1"].shape[1]
    wcols = max(128, _round_up(f, 128))
    w_pack = jnp.zeros((128, wcols), jnp.float32)
    w_pack = w_pack.at[0:64, 0:f].set(params["w1"])                    # fc1 (64, F)
    w_pack = w_pack.at[64:96, 0:64].set(params["w2"])                  # fc2 (32, 64)
    w_pack = w_pack.at[96:112, 0:32].set(params["w3"])                 # fc3 (16, 32)
    w_pack = w_pack.at[112:128, 0:1].set(params["w4"].reshape(16, 1))  # fc4 as column
    b_pack = jnp.zeros((128, 1), jnp.float32)
    b_pack = b_pack.at[0:64, 0].set(params["b1"])
    b_pack = b_pack.at[64:96, 0].set(params["b2"])
    b_pack = b_pack.at[96:112, 0].set(params["b3"])
    b_pack = b_pack.at[112, 0].set(params["b4"][0])
    return w_pack.astype(jnp.bfloat16), b_pack


# ---------------------------------------------------------------------------
# Adaptive tiling
# ---------------------------------------------------------------------------
_VMEM_BUDGET_BYTES = 12 * 1024 * 1024   # fits v5e's 16 MiB default scoped VMEM w/ headroom


def _choose_tiling(batch, f, block_b_cap):
    """Pick (bb, b_pad, n_steps): bb multiple of 128, bb * n_steps == b_pad >= batch,
    each step moving as much as VMEM allows, >=2 steps when possible (v7x megacore)."""
    b128 = _round_up(batch, 128)
    # Per-lane-column VMEM bytes: double-buffered bf16 x tile (4*f) + f32 h1/h2/h3
    # intermediates and their bf16 casts + double-buffered f32 output row (~704).
    bytes_per_col = 4 * f + 704
    bb_budget = max(128, (_VMEM_BUDGET_BYTES // bytes_per_col) // 128 * 128)
    bb_cap = max(128, min(block_b_cap, bb_budget, b128))
    min_steps = 2 if b128 >= 256 else 1                 # >=2 steps -> both TCs on v7x
    n_steps = max(min_steps, pl.cdiv(b128, bb_cap))
    bb = _round_up(pl.cdiv(b128, n_steps), 128)         # bb divides b_pad exactly
    b_pad = n_steps * bb                                # <= b128 + n_steps*128 padding
    return bb, b_pad, n_steps


# ---------------------------------------------------------------------------
# Forward wrapper
# ---------------------------------------------------------------------------
@functools.partial(jax.jit, static_argnames=("block_b",))
def lung_cancer_forward(x, w_pack, b_pack, *, block_b=16384):
    """x: [B, input_dim] (any float dtype). Returns [B, 1] float32 sigmoid scores."""
    batch, f = x.shape
    bb, b_pad, n_steps = _choose_tiling(batch, f, block_b)

    # Pre-transpose + bf16 cast (+ pad) in the wrapper: lane-dense (F, bb) tiles
    # stream straight into the kernel; XLA fuses transpose/cast/pad into one copy.
    x_t = x.astype(jnp.bfloat16).T                      # (F, B) bf16
    if b_pad != batch:
        x_t = jnp.pad(x_t, ((0, 0), (0, b_pad - batch)))

    out = pl.pallas_call(
        _mlp_kernel,
        out_shape=jax.ShapeDtypeStruct((1, b_pad), jnp.float32),
        grid=(n_steps,),
        in_specs=[
            pl.BlockSpec((f, bb), lambda i: (0, i)),        # streamed lane-dense x tile
            pl.BlockSpec(w_pack.shape, lambda i: (0, 0)),   # resident weight slab
            pl.BlockSpec(b_pack.shape, lambda i: (0, 0)),   # resident bias slab
        ],
        out_specs=pl.BlockSpec((1, bb), lambda i: (0, i)),  # lane-dense output row
        compiler_params=pltpu.CompilerParams(
            dimension_semantics=("parallel",)),             # splits across 2 TCs on v7x
    )(x_t, w_pack, b_pack)

    return out[0, :batch].reshape(batch, 1)


# ---------------------------------------------------------------------------
# nn.Linear-style init (PyTorch (out, in) weight layout)
# ---------------------------------------------------------------------------
def init_params(key, input_dim):
    dims = [(input_dim, 64), (64, 32), (32, 16), (16, 1)]
    params = {}
    keys = jax.random.split(key, 2 * len(dims))
    for i, (fan_in, fan_out) in enumerate(dims):
        bound = 1.0 / (fan_in ** 0.5)
        params[f"w{i + 1}"] = jax.random.uniform(
            keys[2 * i], (fan_out, fan_in), jnp.float32, -bound, bound)
        params[f"b{i + 1}"] = jax.random.uniform(
            keys[2 * i + 1], (fan_out,), jnp.float32, -bound, bound)
    return params


def _reference(x, params):
    h = x
    for i in range(1, 4):
        h = jnp.maximum(h @ params[f"w{i}"].T + params[f"b{i}"], 0.0)
    return jax.nn.sigmoid(h @ params["w4"].T + params["b4"]).reshape(-1, 1)


if __name__ == "__main__":
    key = jax.random.PRNGKey(0)
    k_x, k_x2, k_p = jax.random.split(key, 3)

    input_dim = 16  # stand-in for x_train.shape[1]
    params = init_params(k_p, input_dim)
    w_pack, b_pack = pack_params(params)

    # Small batch (single grid step).
    batch = 8
    x = jax.random.normal(k_x, (batch, input_dim), jnp.float32)
    out = jax.block_until_ready(lung_cancer_forward(x, w_pack, b_pack))
    ref = _reference(x, params)
    assert out.shape == (batch, 1)
    assert jnp.allclose(out, ref, atol=2e-2), "mismatch vs reference (small batch)"

    # Non-multiple-of-128 batch: exercises padding + multi-step "parallel" grid.
    batch2 = 300
    x2 = jax.random.normal(k_x2, (batch2, input_dim), jnp.float32)
    out2 = jax.block_until_ready(lung_cancer_forward(x2, w_pack, b_pack))
    ref2 = _reference(x2, params)
    assert out2.shape == (batch2, 1)
    assert jnp.allclose(out2, ref2, atol=2e-2), "mismatch vs reference (padded batch)"

    print("KERNEL_OK")
</pallas_src>

<mosaic_0001>
module attributes {stable_mosaic.version = 11 : i64} {
  func.func @_mlp_kernel(%arg0: i32, %arg1: memref<16x128xbf16, #tpu.memory_space<vmem>>, %arg2: memref<128x128xbf16, #tpu.memory_space<vmem>>, %arg3: memref<128x1xf32, #tpu.memory_space<vmem>>, %arg4: memref<1x128xf32, #tpu.memory_space<vmem>>) attributes {dimension_semantics = [#tpu.dimension_semantics<parallel>], iteration_bounds = array<i64: 1>, scalar_prefetch = 0 : i64, scratch_operands = 0 : i64, tpu.core_type = #tpu.core_type<tc>, window_params = [{transform_indices = @transform_0, window_bounds = array<i64: 16, 128>}, {pipeline_mode = #tpu.pipeline_mode<synchronous>, transform_indices = @transform_1, window_bounds = array<i64: 128, 128>}, {pipeline_mode = #tpu.pipeline_mode<synchronous>, transform_indices = @transform_2, window_bounds = array<i64: 128, 1>}, {transform_indices = @transform_3, window_bounds = array<i64: 1, 128>}]} {
    %c0 = arith.constant 0 : index
    %c0_0 = arith.constant 0 : index
    %0 = vector.load %arg1[%c0, %c0_0] : memref<16x128xbf16, #tpu.memory_space<vmem>>, vector<16x128xbf16>
    %c0_1 = arith.constant 0 : index
    %c0_2 = arith.constant 0 : index
    %1 = vector.load %arg2[%c0_1, %c0_2] : memref<128x128xbf16, #tpu.memory_space<vmem>>, vector<64x16xbf16>
    %c64 = arith.constant 64 : index
    %c0_3 = arith.constant 0 : index
    %2 = vector.load %arg2[%c64, %c0_3] : memref<128x128xbf16, #tpu.memory_space<vmem>>, vector<32x64xbf16>
    %c96 = arith.constant 96 : index
    %c0_4 = arith.constant 0 : index
    %3 = vector.load %arg2[%c96, %c0_4] : memref<128x128xbf16, #tpu.memory_space<vmem>>, vector<16x32xbf16>
    %c112 = arith.constant 112 : index
    %c0_5 = arith.constant 0 : index
    %4 = vector.load %arg2[%c112, %c0_5] : memref<128x128xbf16, #tpu.memory_space<vmem>>, vector<16x1xbf16>
    %5 = arith.extf %4 : vector<16x1xbf16> to vector<16x1xf32>
    %c0_6 = arith.constant 0 : index
    %c0_7 = arith.constant 0 : index
    %6 = vector.load %arg3[%c0_6, %c0_7] : memref<128x1xf32, #tpu.memory_space<vmem>>, vector<64x1xf32>
    %c64_8 = arith.constant 64 : index
    %c0_9 = arith.constant 0 : index
    %7 = vector.load %arg3[%c64_8, %c0_9] : memref<128x1xf32, #tpu.memory_space<vmem>>, vector<32x1xf32>
    %c96_10 = arith.constant 96 : index
    %c0_11 = arith.constant 0 : index
    %8 = vector.load %arg3[%c96_10, %c0_11] : memref<128x1xf32, #tpu.memory_space<vmem>>, vector<16x1xf32>
    %c112_12 = arith.constant 112 : index
    %c0_13 = arith.constant 0 : index
    %9 = vector.load %arg3[%c112_12, %c0_13] : memref<128x1xf32, #tpu.memory_space<vmem>>, vector<1x1xf32>
    %cst = arith.constant dense<0.000000e+00> : vector<64x128xf32>
    %10 = tpu.matmul %1, %0, %cst {dimension_numbers = #tpu.dot_dimension_numbers<[1], [0], [0], [1], [0, 0, 1, 1], [], []>} : vector<64x16xbf16>, vector<16x128xbf16>, vector<64x128xf32> -> vector<64x128xf32>
    %11 = vector.broadcast %6 : vector<64x1xf32> to vector<64x128xf32>
    %12 = arith.addf %10, %11 : vector<64x128xf32>
    %cst_14 = arith.constant 0.000000e+00 : f32
    %13 = vector.broadcast %cst_14 : f32 to vector<64x128xf32>
    %14 = arith.maximumf %12, %13 : vector<64x128xf32>
    %15 = arith.truncf %14 : vector<64x128xf32> to vector<64x128xbf16>
    %cst_15 = arith.constant dense<0.000000e+00> : vector<32x128xf32>
    %16 = tpu.matmul %2, %15, %cst_15 {dimension_numbers = #tpu.dot_dimension_numbers<[1], [0], [0], [1], [0, 0, 1, 1], [], []>} : vector<32x64xbf16>, vector<64x128xbf16>, vector<32x128xf32> -> vector<32x128xf32>
    %17 = vector.broadcast %7 : vector<32x1xf32> to vector<32x128xf32>
    %18 = arith.addf %16, %17 : vector<32x128xf32>
    %cst_16 = arith.constant 0.000000e+00 : f32
    %19 = vector.broadcast %cst_16 : f32 to vector<32x128xf32>
    %20 = arith.maximumf %18, %19 : vector<32x128xf32>
    %21 = arith.truncf %20 : vector<32x128xf32> to vector<32x128xbf16>
    %cst_17 = arith.constant dense<0.000000e+00> : vector<16x128xf32>
    %22 = tpu.matmul %3, %21, %cst_17 {dimension_numbers = #tpu.dot_dimension_numbers<[1], [0], [0], [1], [0, 0, 1, 1], [], []>} : vector<16x32xbf16>, vector<32x128xbf16>, vector<16x128xf32> -> vector<16x128xf32>
    %23 = vector.broadcast %8 : vector<16x1xf32> to vector<16x128xf32>
    %24 = arith.addf %22, %23 : vector<16x128xf32>
    %cst_18 = arith.constant 0.000000e+00 : f32
    %25 = vector.broadcast %cst_18 : f32 to vector<16x128xf32>
    %26 = arith.maximumf %24, %25 : vector<16x128xf32>
    %27 = vector.broadcast %5 : vector<16x1xf32> to vector<16x128xf32>
    %28 = arith.mulf %26, %27 : vector<16x128xf32>
    %cst_19 = arith.constant dense<0.000000e+00> : vector<128xf32>
    %29 = vector.multi_reduction <add>, %28, %cst_19 [0] : vector<16x128xf32> to vector<128xf32>
    %30 = vector.shape_cast %29 : vector<128xf32> to vector<1x128xf32>
    %31 = vector.broadcast %9 : vector<1x1xf32> to vector<1x128xf32>
    %32 = arith.addf %30, %31 : vector<1x128xf32>
    %33 = arith.negf %32 : vector<1x128xf32>
    %34 = math.exp %33 : vector<1x128xf32>
    %cst_20 = arith.constant 1.000000e+00 : f32
    %35 = vector.broadcast %cst_20 : f32 to vector<1x128xf32>
    %36 = arith.addf %35, %34 : vector<1x128xf32>
    %37 = arith.divf %35, %36 : vector<1x128xf32>
    %c0_21 = arith.constant 0 : index
    %c0_22 = arith.constant 0 : index
    %38 = vector.load %arg4[%c0_21, %c0_22] : memref<1x128xf32, #tpu.memory_space<vmem>>, vector<1x128xf32>
    tpu.vector_store %arg4[%c0_21, %c0_22], %37 {strides = array<i32>} : memref<1x128xf32, #tpu.memory_space<vmem>>, vector<1x128xf32>,
    return
  }
  func.func @transform_0(%arg0: i32) -> (i32, i32) {
    %c0_i32 = arith.constant 0 : i32
    %c0_i32_0 = arith.constant 0 : i32
    return %c0_i32, %arg0 : i32, i32
  }
  func.func @transform_1(%arg0: i32) -> (i32, i32) {
    %c0_i32 = arith.constant 0 : i32
    %c0_i32_0 = arith.constant 0 : i32
    %c0_i32_1 = arith.constant 0 : i32
    return %c0_i32, %c0_i32_0 : i32, i32
  }
  func.func @transform_2(%arg0: i32) -> (i32, i32) {
    %c0_i32 = arith.constant 0 : i32
    %c0_i32_0 = arith.constant 0 : i32
    %c0_i32_1 = arith.constant 0 : i32
    return %c0_i32, %c0_i32_0 : i32, i32
  }
  func.func @transform_3(%arg0: i32) -> (i32, i32) {
    %c0_i32 = arith.constant 0 : i32
    %c0_i32_0 = arith.constant 0 : i32
    return %c0_i32, %arg0 : i32, i32
  }
}

</mosaic_0001>

<bundles_post_ra>
// kernel: lung_cancer_forward.1
= control target key start
LH: loop header
LB: loop body
LE: loop exit
PB: predicated region body
PF: predicated region fallthrough
CT: control target
= control target key end

     0   :  { %vm116_vm0 = vcmask 130048   ;;  %v483_v1 = vmov 0   ;;  %vm236_vm1 = vcmask 523264   ;;  %v484_v63 = vmov 0.0   ;;  %s587_s0 = inlined_call_operand.vmem [shape: bf16[16,128], index: 0, kind: input, shape index: {}]   ;;  %s588_s1 = inlined_call_operand.vmem [shape: bf16[128,128], index: 1, kind: input, shape index: {}]   ;;  %s589_s2 = inlined_call_operand.vmem [shape: f32[128,1], index: 2, kind: input, shape index: {}]   ;;  %s590_s3 = inlined_call_operand.vmem [shape: f32[1,128], index: 3, kind: output, shape index: {}]  }
   0x1   :  { %v471_v0 = vld [vmem:[%s587_s0] sm:$0xff]   ;;  %464 = vset.pattern.permute.xlu0 %v483_v1  ;;  %465 = vset.pattern.permute.xlu1 %v483_v1  ;;  %v473_v3 = vld [vmem:[%s588_s1 + $0x8] sm:$0xff]   ;;  %v474_v4 = vld [vmem:[%s588_s1 + $0x10] sm:$0xff]   ;;  %vm485_vm2 = vmmov 0   ;;  %vm313_vm3 = vcmask 261120  }
   0x2   :  { %v472_v2 = vld [vmem:[%s588_s1] sm:$0xff]   ;;  %431 = vmatprep.subr.bf16.mxu0 %v471_v0  ;;  %v37_v6 = vld [vmem:[%s589_s2 + $0x10] sm:$0xff]  ;;  %v36_v7 = vld [vmem:[%s589_s2 + $0x8] sm:$0xff] }
   0x3   :  { %432 = vmatpush3.bf16.msra.mxu0 %v471_v0  ;;  %433 = vmatprep.mubr.msk.bf16.mxu0 %vm116_vm0, %v472_v2  ;;  %v35_v5 = vld [vmem:[%s589_s2] sm:$0xff]  ;;  %v38_v8 = vld [vmem:[%s589_s2 + $0x18] sm:$0xff]  ;;  %v40_v11 = vld [vmem:[%s589_s2 + $0x28] sm:$0xff] }
   0x4   :  { %52 = vperm.xlu0 %464, %v35_v5   ;;  %62 = vperm.xlu1 %465, %v37_v6   ;;  %v475_v9 = vld [vmem:[%s588_s1 + $0x18] sm:$0xff]   ;;  %v39_v10 = vld [vmem:[%s589_s2 + $0x20] sm:$0xff]  ;;  %v41_v12 = vld [vmem:[%s589_s2 + $0x30] sm:$0xff] }
   0x5   :  { %v42_v13 = vld [vmem:[%s589_s2 + $0x38] sm:$0xff]  ;;  %v43_v14 = vld [vmem:[%s589_s2 + $0x40] sm:$0xff]  ;;  %v44_v15 = vld [vmem:[%s589_s2 + $0x48] sm:$0xff]  ;;  %453 = vmatprep.subr.bf16.mxu0 %v484_v63 }
   0x6   :  { %434 = vmatmul.mubr.msk.bf16.vlgmr.msra.gmra.mrb[0].mxu0 %vm116_vm0, %v473_v3  ;;  %v45_v16 = vld [vmem:[%s589_s2 + $0x50] sm:$0xff]  ;;  %v416_v17 = vld [vmem:[%s588_s1 + $0x38] sm:$0xff]   ;;  %v47_v21 = vld [vmem:[%s589_s2 + $0x60] sm:$0xff] }
   0x7   :  { %437 = vmatprep.mubr.msk.bf16.mxu0 %vm116_vm0, %v474_v4  ;;  %v46_v18 = vld [vmem:[%s589_s2 + $0x58] sm:$0xff]  ;;  %v414_v19 = vunpack.c.l.bf16 %v416_v17  ;;  %v415_v20 = vunpack.c.h.bf16 %v416_v17  ;;  %v48_v22 = vld [vmem:[%s589_s2 + $0x68] sm:$0xff]  ;;  %v49_v24 = vld [vmem:[%s589_s2 + $0x70] sm:$0x1] }
   0x8   :  { %57 = vperm.xlu0 %464, %v36_v7   ;;  %67 = vperm.xlu1 %465, %v38_v8   ;;  %v476_v25 = vld [vmem:[%s588_s1 + $0x20] sm:$0xff]   ;;  %v477_v62 = vld [vmem:[%s588_s1 + $0x28] sm:$0xff]  }
   0x9   :  { %v466_v23 = vpack.i.bf16 %v415_v20, %v414_v19  ;;  %449 = vmatprep.mubr.msk.bf16.mxu1 %vm236_vm1, %v476_v25 }
   0xc   :  { %72 = vperm.xlu0 %464, %v39_v10   ;;  %77 = vperm.xlu1 %465, %v40_v11  }
   0xe   :  { %438 = vmatmul.mubr.msk.bf16.gmra.mrb[4].mxu0 %vm116_vm0, %v475_v9 }
   0xf   :  { %457 = vmatprep.mubr.msk.bf16.mxu0 %vm485_vm2, %v484_v63 }
  0x10   :  { %82 = vperm.xlu0 %464, %v41_v12   ;;  %87 = vperm.xlu1 %465, %v42_v13  }
  0x14   :  { %208 = vperm.xlu0 %464, %v43_v14   ;;  %213 = vperm.xlu1 %465, %v44_v15  }
  0x18   :  { %218 = vperm.xlu0 %464, %v45_v16   ;;  %223 = vperm.xlu1 %465, %v46_v18   ;;  %v478_v18 = vld [vmem:[%s588_s1 + $0x30] sm:$0xff]  }
  0x1c   :  { %300 = vperm.xlu0 %464, %v47_v21   ;;  %305 = vperm.xlu1 %465, %v48_v22  }
  0x20   :  { %467 = vperm.xlu0 %464, %v466_v23   ;;  %381 = vperm.xlu1 %465, %v49_v24  }
  0x83   :  { %v53_v26 = vpop.permute.xlu0 %52  ;;  %v63_v27 = vpop.permute.xlu1 %62 }
  0x87   :  { %v58_v28 = vpop.permute.xlu0 %57  ;;  %v68_v29 = vpop.permute.xlu1 %67 }
  0x8b   :  { %v73_v33 = vpop.permute.xlu0 %72  ;;  %v78_v38 = vpop.permute.xlu1 %77 }
  0x8f   :  { %v83_v45 = vpop.permute.xlu0 %82  ;;  %v88_v50 = vpop.permute.xlu1 %87 }
  0x93   :  { %v209_v0 = vpop.permute.xlu0 %208  ;;  %v214_v1 = vpop.permute.xlu1 %213 }
  0x97   :  { %v219_v2 = vpop.permute.xlu0 %218  ;;  %v224_v6 = vpop.permute.xlu1 %223 }
  0x9b   :  { %v301_v19 = vpop.permute.xlu0 %300  ;;  %v306_v21 = vpop.permute.xlu1 %305 }
  0x9f   :  { %v468_v24 = vpop.permute.xlu0 %467 }
  0xd9   :  { %v435_v30 = vpop.f32.mrb[0].mxu0 }
  0xda   :  { %v172_v31 = vadd.f32 %v435_v30, %v63_v27  ;;  %v163_v32 = vpop.f32.mrb[1].mxu0  ;;  %v469_v30 = vunpack.i.l.bf16 %v468_v24 }
  0xdb   :  { %v164_v34 = vadd.f32 %v163_v32, %v53_v26  ;;  %v436_v35 = vpop.f32.mrb[2].mxu0 }
  0xdc   :  { %v175_v36 = vadd.f32 %v436_v35, %v68_v29  ;;  %v166_v37 = vpop.f32.mrb[3].mxu0  ;;  %v196_v40 = vmax.f32 %v172_v31, 0.0  ;;  %v470_v29 = vunpack.i.h.bf16 %v468_v24 }
  0xdd   :  { %v167_v39 = vadd.f32 %v166_v37, %v58_v28  ;;  %v194_v42 = vmax.f32 %v164_v34, 0.0 }
  0xde   :  { %v197_v41 = vmax.f32 %v175_v36, 0.0 }
  0xdf   :  { %v195_v43 = vmax.f32 %v167_v39, 0.0 }
  0xe0   :  { %v203_v44 = vpack.c.bf16 %v197_v41, %v196_v40  ;;  %v382_v41 = vpop.permute.xlu1 %381 }
  0xe1   :  { %v439_v46 = vpop.f32.mrb[4].mxu0  ;;  %v202_v47 = vpack.c.bf16 %v195_v43, %v194_v42 }
  0xe2   :  { %v188_v48 = vadd.f32 %v439_v46, %v83_v45  ;;  %v179_v49 = vpop.f32.mrb[5].mxu0 }
  0xe3   :  { %v180_v51 = vadd.f32 %v179_v49, %v73_v33  ;;  %v440_v52 = vpop.f32.mrb[6].mxu0  ;;  %441 = vmatprep.subr.bf16.mxu1 %v202_v47 }
  0xe4   :  { %v191_v53 = vadd.f32 %v440_v52, %v88_v50  ;;  %v182_v54 = vpop.f32.mrb[7].mxu0  ;;  %442 = vmatpush3.bf16.msra.mxu1 %v202_v47  ;;  %v200_v56 = vmax.f32 %v188_v48, 0.0 }
  0xe5   :  { %v183_v55 = vadd.f32 %v182_v54, %v78_v38  ;;  %443 = vmatprep.subr.bf16.mxu1 %v203_v44  ;;  %v198_v58 = vmax.f32 %v180_v51, 0.0 }
  0xe6   :  { %v201_v57 = vmax.f32 %v191_v53, 0.0 }
  0xe7   :  { %v199_v59 = vmax.f32 %v183_v55, 0.0 }
  0xe8   :  { %v205_v60 = vpack.c.bf16 %v201_v57, %v200_v56  ;;  %444 = vmatpush3.bf16.msra.mxu1 %v203_v44 }
  0xe9   :  { %v204_v61 = vpack.c.bf16 %v199_v59, %v198_v58 }
  0xeb   :  { %445 = vmatprep.subr.bf16.mxu1 %v204_v61 }
  0xec   :  { %446 = vmatpush3.bf16.msra.mxu1 %v204_v61 }
  0xed   :  { %447 = vmatprep.subr.bf16.mxu1 %v205_v60 }
  0xf0   :  { %448 = vmatpush3.bf16.msra.mxu1 %v205_v60 }
  0xf3   :  { %450 = vmatmul.mubr.msk.bf16.vlgmr.msra.gmra.mrb[0].mxu1 %vm236_vm1, %v477_v62 }
 0x1c6   :  { %v451_v3 = vpop.f32.mrb[0].mxu1 }
 0x1c7   :  { %v286_v4 = vadd.f32 %v451_v3, %v219_v2  ;;  %v277_v5 = vpop.f32.mrb[1].mxu1 }
 0x1c8   :  { %v278_v7 = vadd.f32 %v277_v5, %v209_v0  ;;  %v452_v8 = vpop.f32.mrb[2].mxu1 }
 0x1c9   :  { %v289_v9 = vadd.f32 %v452_v8, %v224_v6  ;;  %v280_v10 = vpop.f32.mrb[3].mxu1  ;;  %v294_v12 = vmax.f32 %v286_v4, 0.0 }
 0x1ca   :  { %v281_v11 = vadd.f32 %v280_v10, %v214_v1  ;;  %v292_v14 = vmax.f32 %v278_v7, 0.0 }
 0x1cb   :  { %v295_v13 = vmax.f32 %v289_v9, 0.0 }
 0x1cc   :  { %v293_v15 = vmax.f32 %v281_v11, 0.0 }
 0x1cd   :  { %v297_v16 = vpack.c.bf16 %v295_v13, %v294_v12 }
 0x1ce   :  { %v296_v17 = vpack.c.bf16 %v293_v15, %v292_v14 }
 0x1d0   :  { %454 = vmatpush3.bf16.msra.mxu0 %v296_v17 }
 0x1d1   :  { %455 = vmatprep.subr.bf16.mxu0 %v484_v63 }
 0x1d4   :  { %456 = vmatpush3.bf16.msra.mxu0 %v297_v16 }
 0x1d7   :  { %458 = vmatmul.mubr.msk.bf16.vlgmr.msra.gmra.mrb[8].mxu0 %vm313_vm3, %v478_v18 }
 0x2aa   :  { %v351_v20 = vpop.f32.mrb[8].mxu0 }
 0x2ab   :  { %v352_v22 = vadd.f32 %v351_v20, %v301_v19  ;;  %v459_v23 = vpop.f32.mrb[9].mxu0 }
 0x2ac   :  { %v354_v25 = vpop.f32.mrb[10].mxu0 }
 0x2ad   :  { %v358_v26 = vmax.f32 %v352_v22, 0.0  ;;  %v355_v27 = vadd.f32 %v354_v25, %v306_v21  ;;  %v460_v28 = vpop.f32.mrb[11].mxu0 }
 0x2af   :  { %v359_v31 = vmax.f32 %v355_v27, 0.0  ;;  %v370_v32 = vmul.f32 %v469_v30, %v358_v26 }
 0x2b1   :  { %v371_v33 = vmul.f32 %v470_v29, %v359_v31 }
 0x2b3   :  { %v372_v34 = vadd.f32 %v371_v33, %v370_v32 }
 0x2b5   :  { %v373_v35 = vrot.slane %v372_v34, 4 }
 0x2b7   :  { %v374_v36 = vadd.f32 %v373_v35, %v372_v34 }
 0x2b9   :  { %v375_v37 = vrot.slane %v374_v36, 2 }
 0x2bb   :  { %v376_v38 = vadd.f32 %v375_v37, %v374_v36 }
 0x2bd   :  { %v377_v39 = vrot.slane %v376_v38, 1 }
 0x2bf   :  { %v378_v40 = vadd.f32 %v377_v39, %v376_v38 }
 0x2c1   :  { %v384_v42 = vadd.f32 %v382_v41, %v378_v40 }
 0x2c3   :  { %v411_v43 = vmul.f32 -1.442695, %v384_v42 }
 0x2c5   :  { %479 = vpow2.f32 %v411_v43 }
 0x2cf   :  { %v480_v44 = vpop.eup %479 }
 0x2d0   :  { %v388_v45 = vadd.f32 1.0, %v480_v44 }
 0x2d2   :  { %481 = vrcp.f32 %v388_v45 }
 0x2dc   :  { %v482_v46 = vpop.eup %481 }
 0x2dd   :  { %391 = vst [vmem:[%s590_s3] sm:$0x1] %v482_v46 }

</bundles_post_ra>
